<compile_context>
chip_gen: v6e
topology: v6e:2x2x1
jax: 0.10.0
libtpu: 0.0.40
codegen_flags: <defaults>
</compile_context>

<pallas_src>
import numpy as np
import jax
import jax.numpy as jnp
from jax.experimental import pallas as pl
from jax.experimental.pallas import tpu as pltpu


def _round_up(a: int, b: int) -> int:
    return (a + b - 1) // b * b


def _vmem_limit_bytes() -> int:
    """Generation-aware scoped-VMEM limit (bytes), with safe fallbacks."""
    physical = 64 * 1024 * 1024  # conservative default (v7x per-TensorCore)
    try:
        info = pltpu.get_tpu_info()
        physical = int(getattr(info, "vmem_capacity_bytes", physical)) or physical
    except Exception:
        pass
    try:
        if "v7" in jax.devices()[0].device_kind.lower():
            physical = min(physical, 64 * 1024 * 1024)
    except Exception:
        pass
    # ~30% headroom for compiler temps; never below the 32 MiB default, never
    # above 100 MiB even on 128 MiB parts.
    return int(max(32 * 1024 * 1024, min(0.7 * physical, 100 * 1024 * 1024)))


def _tpu_num_tensorcores() -> int:
    try:
        kind = jax.devices()[0].device_kind.lower()
    except Exception:
        return 1
    return 2 if "v7" in kind else 1


def _kde_kernel(x2_ref, s_ref, sb_ref, rc_ref, out_ref, m_ref, l_ref):
    # x2_ref : VMEM (tm, D)  = 2*scale*X tile (resident across the N sweep)
    # s_ref  : VMEM (tn, D)  = svs tile (streamed over k)
    # sb_ref : VMEM (tn, 1)  f32 = -scale*||s||^2   (-inf on padded svs rows)
    # rc_ref : VMEM (1, tm)  f32 = -scale*||x||^2 - log(N) + D/2*log(scale/pi)
    # out_ref: VMEM (1, tm)  f32
    # m_ref / l_ref: VMEM (1, tm) f32 online-logsumexp accumulators
    k = pl.program_id(1)

    @pl.when(k == 0)
    def _init():
        m_ref[...] = jnp.full(m_ref.shape, -jnp.inf, jnp.float32)
        l_ref[...] = jnp.zeros(l_ref.shape, jnp.float32)

    # (tn, tm) score panel on the MXU: contract the lane (D) dim of both
    # operands -> no transpose/relayout of either tile; operands stay in their
    # storage dtype (bf16 or f32), accumulation in f32.
    z = jax.lax.dot_general(
        s_ref[...], x2_ref[...],
        dimension_numbers=(((1,), (1,)), ((), ())),
        preferred_element_type=jnp.float32)                  # (tn, tm)
    z = z + sb_ref[...]                                      # bias column (padded rows -> -inf)

    # Online logsumexp over the sublane (N) axis -> lane-major (1, tm).
    m_prev = m_ref[...]
    m_new = jnp.maximum(m_prev, jnp.max(z, axis=0, keepdims=True))
    l_ref[...] = (l_ref[...] * jnp.exp(m_prev - m_new)
                  + jnp.sum(jnp.exp(z - m_new), axis=0, keepdims=True))
    m_ref[...] = m_new

    @pl.when(k == pl.num_programs(1) - 1)
    def _finalize():
        out_ref[...] = m_ref[...] + jnp.log(l_ref[...]) + rc_ref[...]


def kde_forward(x, svs, scale, *, tm=None, tn=None, mxu_dtype=None, svs_buffers=None):
    """x: (M, D), svs: (N, D), scale: scalar -> log_p: (M,) f32."""
    M, D = x.shape
    N, D2 = svs.shape
    assert D == D2

    scale_f = jnp.asarray(scale, jnp.float32)

    # MXU feed dtype: bf16 inputs are used directly (no upcast); f32 inputs
    # stay f32 unless the caller forces bf16 for extra throughput.
    if mxu_dtype is None:
        mxu_dtype = (jnp.bfloat16
                     if (x.dtype == jnp.bfloat16 and svs.dtype == jnp.bfloat16)
                     else jnp.float32)
    mxu_dtype = jnp.dtype(mxu_dtype)
    esize = mxu_dtype.itemsize
    align_n = 16 if esize < 4 else 8

    vmem_limit = _vmem_limit_bytes()
    budget = int(vmem_limit * 0.85)
    num_cores = _tpu_num_tensorcores()

    # ---- tm: lane dimension everywhere; always a multiple of 128.
    if tm is None:
        tm = 128
        for cand in (512, 384, 256, 128):
            if 2 * cand * D * esize <= budget // 3:   # double-buffered X stream
                tm = cand
                break
        tm = min(tm, _round_up(M, 128))
        if num_cores >= 2 and M > 128:
            # Keep >= 2 M tiles so the "parallel" axis feeds both TensorCores.
            tm = max(128, min(tm, _round_up((M + 1) // 2, 128)))
    else:
        tm = max(128, _round_up(int(tm), 128))
    Mp = _round_up(M, tm)
    num_m = Mp // tm

    # ---- tn: sublane dim of the streamed svs tile, sized from the VMEM budget
    #      assuming up to 3 svs buffers + 2 X buffers + f32 panel temps.
    if tn is None:
        fixed = 2 * tm * D * esize + 8 * tm * 4 + (64 << 10)
        per_tn = 3 * D * esize + 2 * 4 + 3 * tm * 4
        tn = max(align_n, min((budget - fixed) // per_tn, 2048))
        tn = (tn // align_n) * align_n
    else:
        tn = max(align_n, _round_up(int(tn), align_n))
    if tn >= N:
        tn = _round_up(N, align_n)
    Np = _round_up(N, tn)
    num_n = Np // tn

    # Triple-buffer the svs stream only when per-step compute is short (small D)
    # and there are enough reduction steps for it to matter.
    if svs_buffers is None:
        svs_buffers = 3 if (D <= 256 and num_n >= 3) else 2

    # ---- wrapper-side precomputes (all O(M*D) / O(N*D), done once).
    x_f32 = x.astype(jnp.float32)
    svs_f32 = svs.astype(jnp.float32)

    x2 = (x_f32 * (2.0 * scale_f)).astype(mxu_dtype)          # 2*scale*X
    if Mp != M:
        x2 = jnp.pad(x2, ((0, Mp - M), (0, 0)))
    sf = svs.astype(mxu_dtype)
    if Np != N:
        sf = jnp.pad(sf, ((0, Np - N), (0, 0)))

    # Per-SV bias column; padded rows forced to -inf so they add exp(-inf)=0.
    sv_bias = (-scale_f) * jnp.sum(svs_f32 * svs_f32, axis=-1)        # (N,)
    if Np != N:
        sv_bias = jnp.pad(sv_bias, (0, Np - N), constant_values=-np.inf)
    sv_bias = sv_bias.reshape(Np, 1)

    # Per-query constant (independent of the N sweep).
    const = -jnp.log(jnp.float32(N)) + (D / 2.0) * jnp.log(scale_f / jnp.float32(np.pi))
    row_const = (-scale_f) * jnp.sum(x_f32 * x_f32, axis=-1) + const  # (M,)
    if Mp != M:
        row_const = jnp.pad(row_const, (0, Mp - M))
    row_const = row_const.reshape(num_m, 1, tm)

    svs_spec_kwargs = {}
    if svs_buffers != 2:
        svs_spec_kwargs["pipeline_mode"] = pl.Buffered(svs_buffers)
    svs_spec = pl.BlockSpec((tn, D), lambda i, k: (k, 0), **svs_spec_kwargs)

    out = pl.pallas_call(
        _kde_kernel,
        out_shape=jax.ShapeDtypeStruct((num_m, 1, tm), jnp.float32),
        grid=(num_m, num_n),
        in_specs=[
            pl.BlockSpec((tm, D), lambda i, k: (i, 0)),            # 2*scale*X tile (resident over k)
            svs_spec,                                              # svs tile (streamed over k)
            pl.BlockSpec((tn, 1), lambda i, k: (k, 0)),            # -scale*||s||^2 (+pad mask)
            pl.BlockSpec((None, 1, tm), lambda i, k: (i, 0, 0)),   # per-query constant
        ],
        out_specs=pl.BlockSpec((None, 1, tm), lambda i, k: (i, 0, 0)),
        scratch_shapes=[
            pltpu.VMEM((1, tm), jnp.float32),    # running max
            pltpu.VMEM((1, tm), jnp.float32),    # running sum
        ],
        compiler_params=pltpu.CompilerParams(
            dimension_semantics=("parallel", "arbitrary"),
            vmem_limit_bytes=vmem_limit,
        ),
        cost_estimate=pl.CostEstimate(
            flops=2 * Mp * Np * D,
            transcendentals=Mp * Np,
            bytes_accessed=(Mp * D * esize + num_m * Np * D * esize
                            + num_m * Np * 4 + 2 * Mp * 4),
        ),
    )(x2, sf, sv_bias, row_const)

    return out.reshape(Mp)[:M]


def _fit_scale(svs):
    """Deterministic scale init (the pre-EM estimate from KDE.fit):
    scale = 1 / mean(off-diagonal squared pairwise distances).
    # TODO(synk): the iterative EM refinement loop in fit() is host-side glue
    # and is not part of forward(); only the initial closed-form scale is used.
    """
    svs = svs.astype(jnp.float32)
    n = svs.shape[0]
    ss = jnp.sum(svs * svs, axis=-1)
    d2 = jnp.maximum(ss[:, None] + ss[None, :] - 2.0 * (svs @ svs.T), 0.0)
    mask = 1.0 - jnp.eye(n, dtype=jnp.float32)
    return 1.0 / (jnp.sum(d2 * mask) / (n * (n - 1)))


def _kde_forward_ref(x, svs, scale):
    x = x.astype(jnp.float32)
    svs = svs.astype(jnp.float32)
    d2 = jnp.maximum(
        jnp.sum(x * x, -1)[:, None] + jnp.sum(svs * svs, -1)[None, :] - 2.0 * x @ svs.T,
        0.0,
    )
    N, D = svs.shape
    return (jax.scipy.special.logsumexp(-scale * d2, axis=-1)
            - jnp.log(N) + D / 2.0 * jnp.log(scale / jnp.float32(np.pi)))


if __name__ == "__main__":
    key = jax.random.PRNGKey(0)
    k1, k2, k3, k4 = jax.random.split(key, 4)

    # 1) Small deterministic smoke test matching the module's forward() (f32 path).
    M, N, D = 8, 64, 32
    svs = jax.random.normal(k1, (N, D), dtype=jnp.float32)   # "fitted" support vectors
    x = jax.random.normal(k2, (M, D), dtype=jnp.float32)
    scale = _fit_scale(svs)

    log_p = kde_forward(x, svs, scale)
    jax.block_until_ready(log_p)
    ref = _kde_forward_ref(x, svs, scale)
    np.testing.assert_allclose(np.asarray(log_p), np.asarray(ref), rtol=1e-5, atol=1e-5)

    # 2) Tiled grid: multiple M tiles (parallel axis), multiple N tiles with
    #    masked svs padding and triple-buffered svs stream (f32 path).
    M2, N2, D2 = 300, 200, 128
    svs2 = jax.random.normal(k3, (N2, D2), dtype=jnp.float32)
    x2 = jax.random.normal(k4, (M2, D2), dtype=jnp.float32)
    scale2 = _fit_scale(svs2)
    log_p2 = kde_forward(x2, svs2, scale2, tm=128, tn=32)
    jax.block_until_ready(log_p2)
    ref2 = _kde_forward_ref(x2, svs2, scale2)
    np.testing.assert_allclose(np.asarray(log_p2), np.asarray(ref2), rtol=1e-5, atol=1e-5)

    # 3) bf16 MXU-feeding path (f32 accumulate): relaxed tolerance vs f32 reference.
    log_p3 = kde_forward(x2, svs2, scale2, mxu_dtype=jnp.bfloat16)
    jax.block_until_ready(log_p3)
    np.testing.assert_allclose(np.asarray(log_p3), np.asarray(ref2), rtol=1e-4, atol=5e-2)

    print("KERNEL_OK")
</pallas_src>

<mosaic_0001>
module attributes {stable_mosaic.version = 11 : i64} {
  func.func @_kde_kernel(%arg0: i32, %arg1: i32, %arg2: memref<128x32xf32, #tpu.memory_space<vmem>>, %arg3: memref<64x32xf32, #tpu.memory_space<vmem>>, %arg4: memref<64x1xf32, #tpu.memory_space<vmem>>, %arg5: memref<1x1x128xf32, #tpu.memory_space<vmem>>, %arg6: memref<1x1x128xf32, #tpu.memory_space<vmem>>, %arg7: memref<1x128xf32, #tpu.memory_space<vmem>>, %arg8: memref<1x128xf32, #tpu.memory_space<vmem>>) attributes {dimension_semantics = [#tpu.dimension_semantics<parallel>, #tpu.dimension_semantics<arbitrary>], iteration_bounds = array<i64: 1, 1>, scalar_prefetch = 0 : i64, scratch_operands = 2 : i64, tpu.core_type = #tpu.core_type<tc>, window_params = [{transform_indices = @transform_0, window_bounds = array<i64: 128, 32>}, {transform_indices = @transform_1, window_bounds = array<i64: 64, 32>}, {transform_indices = @transform_2, window_bounds = array<i64: 64, 1>}, {transform_indices = @transform_3, window_bounds = array<i64: 1, 1, 128>}, {transform_indices = @transform_4, window_bounds = array<i64: 1, 1, 128>}]} {
    %c0_i32 = arith.constant 0 : i32
    %0 = arith.cmpi eq, %arg1, %c0_i32 : i32
    %1 = arith.extui %0 : i1 to i32
    %c0_i32_0 = arith.constant 0 : i32
    %2 = arith.cmpi ne, %1, %c0_i32_0 : i32
    scf.if %2 {
      %cst_18 = arith.constant 0xFF800000 : f32
      %28 = vector.broadcast %cst_18 : f32 to vector<1x128xf32>
      %c0_19 = arith.constant 0 : index
      %c0_20 = arith.constant 0 : index
      %29 = vector.load %arg7[%c0_19, %c0_20] : memref<1x128xf32, #tpu.memory_space<vmem>>, vector<1x128xf32>
      tpu.vector_store %arg7[%c0_19, %c0_20], %28 {strides = array<i32>} : memref<1x128xf32, #tpu.memory_space<vmem>>, vector<1x128xf32>,
      %cst_21 = arith.constant 0.000000e+00 : f32
      %30 = vector.broadcast %cst_21 : f32 to vector<1x128xf32>
      %c0_22 = arith.constant 0 : index
      %c0_23 = arith.constant 0 : index
      %31 = vector.load %arg8[%c0_22, %c0_23] : memref<1x128xf32, #tpu.memory_space<vmem>>, vector<1x128xf32>
      tpu.vector_store %arg8[%c0_22, %c0_23], %30 {strides = array<i32>} : memref<1x128xf32, #tpu.memory_space<vmem>>, vector<1x128xf32>,
    } else {
    }
    %c0 = arith.constant 0 : index
    %c0_1 = arith.constant 0 : index
    %3 = vector.load %arg3[%c0, %c0_1] : memref<64x32xf32, #tpu.memory_space<vmem>>, vector<64x32xf32>
    %c0_2 = arith.constant 0 : index
    %c0_3 = arith.constant 0 : index
    %4 = vector.load %arg2[%c0_2, %c0_3] : memref<128x32xf32, #tpu.memory_space<vmem>>, vector<128x32xf32>
    %cst = arith.constant dense<0.000000e+00> : vector<64x128xf32>
    %5 = tpu.matmul %3, %4, %cst {dimension_numbers = #tpu.dot_dimension_numbers<[1], [1], [0], [0], [0, 0, 1, 0], [], []>} : vector<64x32xf32>, vector<128x32xf32>, vector<64x128xf32> -> vector<64x128xf32>
    %c0_4 = arith.constant 0 : index
    %c0_5 = arith.constant 0 : index
    %6 = vector.load %arg4[%c0_4, %c0_5] : memref<64x1xf32, #tpu.memory_space<vmem>>, vector<64x1xf32>
    %7 = vector.broadcast %6 : vector<64x1xf32> to vector<64x128xf32>
    %8 = arith.addf %5, %7 : vector<64x128xf32>
    %c0_6 = arith.constant 0 : index
    %c0_7 = arith.constant 0 : index
    %9 = vector.load %arg7[%c0_6, %c0_7] : memref<1x128xf32, #tpu.memory_space<vmem>>, vector<1x128xf32>
    %cst_8 = arith.constant dense<0xFF800000> : vector<128xf32>
    %10 = vector.multi_reduction <maximumf>, %8, %cst_8 [0] : vector<64x128xf32> to vector<128xf32>
    %11 = vector.shape_cast %10 : vector<128xf32> to vector<1x128xf32>
    %12 = arith.maximumf %9, %11 : vector<1x128xf32>
    %c0_9 = arith.constant 0 : index
    %c0_10 = arith.constant 0 : index
    %13 = vector.load %arg8[%c0_9, %c0_10] : memref<1x128xf32, #tpu.memory_space<vmem>>, vector<1x128xf32>
    %14 = arith.subf %9, %12 : vector<1x128xf32>
    %15 = math.exp %14 : vector<1x128xf32>
    %16 = arith.mulf %13, %15 : vector<1x128xf32>
    %17 = vector.broadcast %12 : vector<1x128xf32> to vector<64x128xf32>
    %18 = arith.subf %8, %17 : vector<64x128xf32>
    %19 = math.exp %18 : vector<64x128xf32>
    %cst_11 = arith.constant dense<0.000000e+00> : vector<128xf32>
    %20 = vector.multi_reduction <add>, %19, %cst_11 [0] : vector<64x128xf32> to vector<128xf32>
    %21 = vector.shape_cast %20 : vector<128xf32> to vector<1x128xf32>
    %22 = arith.addf %16, %21 : vector<1x128xf32>
    %c0_12 = arith.constant 0 : index
    %c0_13 = arith.constant 0 : index
    %23 = vector.load %arg8[%c0_12, %c0_13] : memref<1x128xf32, #tpu.memory_space<vmem>>, vector<1x128xf32>
    tpu.vector_store %arg8[%c0_12, %c0_13], %22 {strides = array<i32>} : memref<1x128xf32, #tpu.memory_space<vmem>>, vector<1x128xf32>,
    %c0_14 = arith.constant 0 : index
    %c0_15 = arith.constant 0 : index
    %24 = vector.load %arg7[%c0_14, %c0_15] : memref<1x128xf32, #tpu.memory_space<vmem>>, vector<1x128xf32>
    tpu.vector_store %arg7[%c0_14, %c0_15], %12 {strides = array<i32>} : memref<1x128xf32, #tpu.memory_space<vmem>>, vector<1x128xf32>,
    %c0_i32_16 = arith.constant 0 : i32
    %25 = arith.cmpi eq, %arg1, %c0_i32_16 : i32
    %26 = arith.extui %25 : i1 to i32
    %c0_i32_17 = arith.constant 0 : i32
    %27 = arith.cmpi ne, %26, %c0_i32_17 : i32
    scf.if %27 {
      %c0_18 = arith.constant 0 : index
      %c0_19 = arith.constant 0 : index
      %28 = vector.load %arg7[%c0_18, %c0_19] : memref<1x128xf32, #tpu.memory_space<vmem>>, vector<1x128xf32>
      %c0_20 = arith.constant 0 : index
      %c0_21 = arith.constant 0 : index
      %29 = vector.load %arg8[%c0_20, %c0_21] : memref<1x128xf32, #tpu.memory_space<vmem>>, vector<1x128xf32>
      %30 = math.log %29 : vector<1x128xf32>
      %31 = arith.addf %28, %30 : vector<1x128xf32>
      %c0_22 = arith.constant 0 : index
      %c0_23 = arith.constant 0 : index
      %c0_24 = arith.constant 0 : index
      %32 = vector.load %arg5[%c0_22, %c0_23, %c0_24] : memref<1x1x128xf32, #tpu.memory_space<vmem>>, vector<1x1x128xf32>
      %33 = vector.shape_cast %32 : vector<1x1x128xf32> to vector<1x128xf32>
      %34 = arith.addf %31, %33 : vector<1x128xf32>
      %c0_25 = arith.constant 0 : index
      %c0_26 = arith.constant 0 : index
      %c0_27 = arith.constant 0 : index
      %35 = vector.load %arg6[%c0_25, %c0_26, %c0_27] : memref<1x1x128xf32, #tpu.memory_space<vmem>>, vector<1x1x128xf32>
      %36 = vector.shape_cast %35 : vector<1x1x128xf32> to vector<1x128xf32>
      %37 = vector.shape_cast %34 : vector<1x128xf32> to vector<1x1x128xf32>
      tpu.vector_store %arg6[%c0_25, %c0_26, %c0_27], %37 {strides = array<i32>} : memref<1x1x128xf32, #tpu.memory_space<vmem>>, vector<1x1x128xf32>,
    } else {
    }
    return
  }
  func.func @transform_0(%arg0: i32, %arg1: i32) -> (i32, i32) {
    %c0_i32 = arith.constant 0 : i32
    %c0_i32_0 = arith.constant 0 : i32
    return %arg0, %c0_i32 : i32, i32
  }
  func.func @transform_1(%arg0: i32, %arg1: i32) -> (i32, i32) {
    %c0_i32 = arith.constant 0 : i32
    %c0_i32_0 = arith.constant 0 : i32
    return %arg1, %c0_i32 : i32, i32
  }
  func.func @transform_2(%arg0: i32, %arg1: i32) -> (i32, i32) {
    %c0_i32 = arith.constant 0 : i32
    %c0_i32_0 = arith.constant 0 : i32
    return %arg1, %c0_i32 : i32, i32
  }
  func.func @transform_3(%arg0: i32, %arg1: i32) -> (i32, i32, i32) {
    %c0_i32 = arith.constant 0 : i32
    %c0_i32_0 = arith.constant 0 : i32
    %c0_i32_1 = arith.constant 0 : i32
    return %arg0, %c0_i32, %c0_i32_0 : i32, i32, i32
  }
  func.func @transform_4(%arg0: i32, %arg1: i32) -> (i32, i32, i32) {
    %c0_i32 = arith.constant 0 : i32
    %c0_i32_0 = arith.constant 0 : i32
    %c0_i32_1 = arith.constant 0 : i32
    return %arg0, %c0_i32, %c0_i32_0 : i32, i32, i32
  }
}

</mosaic_0001>

<bundles_post_ra>
// kernel: tpu_custom_call.1
= control target key start
LH: loop header
LB: loop body
LE: loop exit
PB: predicated region body
PF: predicated region fallthrough
CT: control target
= control target key end

     0   :  { %vm96_vm0 = vcmask 261120   ;;  %v537_v3 = vmov 0   ;;  %s740_s0 = inlined_call_operand.vmem [shape: f32[128,32], index: 0, kind: input, shape index: {}]   ;;  %s741_s1 = inlined_call_operand.vmem [shape: f32[64,32], index: 1, kind: input, shape index: {}]   ;;  %s742_s2 = inlined_call_operand.vmem [shape: f32[64,1], index: 2, kind: input, shape index: {}]   ;;  %s743_s3 = inlined_call_operand.vmem [shape: f32[1,1,128], index: 3, kind: input, shape index: {}]   ;;  %s744_s4 = inlined_call_operand.hbm [shape: f32[1,1,128], index: 4, kind: output, shape index: {}]  }
   0x1   :  { %v47_v0 = vld [vmem:[%s740_s0 + $0x78] sm:$0xff]  ;;  %v46_v1 = vld [vmem:[%s740_s0 + $0x70] sm:$0xff]  ;;  %v45_v2 = vld [vmem:[%s740_s0 + $0x68] sm:$0xff]  ;;  %494 = vset.pattern.permute.xlu1 %v537_v3  ;;  %493 = vset.pattern.permute.xlu0 %v537_v3 }
   0x2   :  { %413 = vmatprep.subr.msk.mxu0 %vm96_vm0, %v47_v0  ;;  %457 = vmatprep.subr.msk.mxu1 %vm96_vm0, %v47_v0  ;;  %v24_v4 = vld [vmem:[%s741_s1] sm:$0xff]  ;;  %v50_v7 = vld [vmem:[%s742_s2 + $0x10] sm:$0xff]  ;;  %v51_v9 = vld [vmem:[%s742_s2 + $0x18] sm:$0xff] }
   0x3   :  { %414 = vmatpush3.xpose.msk.msra.mxu0 %vm96_vm0, %v47_v0  ;;  %473 = vmatpush3.xpose.msk.msra.mxu1 %vm96_vm0, %v47_v0  ;;  %v28_v5 = vld [vmem:[%s741_s1 + $0x20] sm:$0xff]  ;;  %v49_v10 = vld [vmem:[%s742_s2 + $0x8] sm:$0xff] }
   0x4   :  { %415 = vmatprep.subr.msk.mxu0 %vm96_vm0, %v46_v1  ;;  %458 = vmatprep.subr.msk.mxu1 %vm96_vm0, %v46_v1  ;;  %v44_v6 = vld [vmem:[%s740_s0 + $0x60] sm:$0xff] }
   0x5   :  { %445 = vmatprep.mubr.msk.f32.mxu0 %vm96_vm0, %v24_v4  ;;  %451 = vmatprep.mubr.msk.f32.mxu1 %vm96_vm0, %v28_v5  ;;  %v48_v8 = vld [vmem:[%s742_s2] sm:$0xff] }
   0x6   :  { %68 = vperm.xlu1 %494, %v50_v7   ;;  %58 = vperm.xlu0 %493, %v48_v8  }
   0x7   :  { %416 = vmatpush3.xpose.msk.msra.mxu0 %vm96_vm0, %v46_v1  ;;  %474 = vmatpush3.xpose.msk.msra.mxu1 %vm96_vm0, %v46_v1 }
   0x8   :  { %417 = vmatprep.subr.msk.mxu0 %vm96_vm0, %v45_v2  ;;  %459 = vmatprep.subr.msk.mxu1 %vm96_vm0, %v45_v2 }
   0xb   :  { %418 = vmatpush3.xpose.msk.msra.mxu0 %vm96_vm0, %v45_v2  ;;  %475 = vmatpush3.xpose.msk.msra.mxu1 %vm96_vm0, %v45_v2 }
   0xc   :  { %9 = vsyncpa [#allocation5], 0  ;;  %419 = vmatprep.subr.msk.mxu0 %vm96_vm0, %v44_v6  ;;  %460 = vmatprep.subr.msk.mxu1 %vm96_vm0, %v44_v6  ;;  %v43_v11 = vld [vmem:[%s740_s0 + $0x58] sm:$0xff]  ;;  %v53_v12 = vld [vmem:[%s742_s2 + $0x28] sm:$0xff]  ;;  %v538_v33 = vmov -inf   ;;  %v539_v34 = vmov 0.0   ;;  %v295_v4 = vlaneseq }
   0xd   :  { %73 = vperm.xlu1 %494, %v51_v9   ;;  %63 = vperm.xlu0 %493, %v49_v10   ;;  %v52_v13 = vld [vmem:[%s742_s2 + $0x20] sm:$0xff]  ;;  %v42_v14 = vld [vmem:[%s740_s0 + $0x50] sm:$0xff]  ;;  %v55_v15 = vld [vmem:[%s742_s2 + $0x38] sm:$0xff]  ;;  %22 = vst [vmem:[#allocation2] sm:$0x1] %v538_v33  ;;  %s540_s25 = smov [#allocation4]  }
   0xe   :  { %v54_v16 = vld [vmem:[%s742_s2 + $0x30] sm:$0xff]  ;;  %v41_v17 = vld [vmem:[%s740_s0 + $0x48] sm:$0xff]  ;;  %v40_v18 = vld [vmem:[%s740_s0 + $0x40] sm:$0xff]  ;;  %23 = vst [vmem:[#allocation3] sm:$0x1] %v539_v34  ;;  %v296_v7 = vshrl.u32 %v295_v4, 7 }
   0xf   :  { %420 = vmatpush3.xpose.msk.msra.mxu0 %vm96_vm0, %v44_v6  ;;  %476 = vmatpush3.xpose.msk.msra.mxu1 %vm96_vm0, %v44_v6  ;;  %v39_v19 = vld [vmem:[%s740_s0 + $0x38] sm:$0xff]  ;;  %v38_v20 = vld [vmem:[%s740_s0 + $0x30] sm:$0xff]  ;;  %v37_v21 = vld [vmem:[%s740_s0 + $0x28] sm:$0xff]  ;;  %s357_s26 = sshll.u32 %s540_s25, 4  ;;  %s358_s26 = int_to_ptr.vmem [resolvable:$true] %s357_s26 }
  0x10   :  { %421 = vmatprep.subr.msk.mxu0 %vm96_vm0, %v43_v11  ;;  %461 = vmatprep.subr.msk.mxu1 %vm96_vm0, %v43_v11  ;;  %v36_v22 = vld [vmem:[%s740_s0 + $0x20] sm:$0xff]  ;;  %v35_v23 = vld [vmem:[%s740_s0 + $0x18] sm:$0xff]  ;;  %v34_v24 = vld [vmem:[%s740_s0 + $0x10] sm:$0xff]  ;;  %s515_s27 = scalar_lea.vmem %s358_s26, 16  ;;  %s519_s28 = scalar_lea.vmem %s358_s26, 32 }
  0x11   :  { %83 = vperm.xlu1 %494, %v53_v12   ;;  %78 = vperm.xlu0 %493, %v52_v13   ;;  %v33_v25 = vld [vmem:[%s740_s0 + $0x8] sm:$0xff]  ;;  %v32_v26 = vld [vmem:[%s740_s0] sm:$0xff]  ;;  %v26_v29 = vld [vmem:[%s741_s1 + $0x10] sm:$0xff]  ;;  %p516_p0 = scmp.ne.s32.totalorder %s358_s26, %s515_s27  ;;  %p520_p1 = scmp.lt.s32.totalorder %s358_s26, %s358_s26 }
  0x12   :  { %v25_v27 = vld [vmem:[%s741_s1 + $0x8] sm:$0xff]  ;;  %v30_v30 = vld [vmem:[%s741_s1 + $0x30] sm:$0xff]  ;;  %v27_v31 = vld [vmem:[%s741_s1 + $0x18] sm:$0xff]  ;;  %p521_p2 = scmp.lt.s32.totalorder %s519_s28, %s515_s27 }
  0x13   :  { %422 = vmatpush3.xpose.msk.msra.mxu0 %vm96_vm0, %v43_v11  ;;  %477 = vmatpush3.xpose.msk.msra.mxu1 %vm96_vm0, %v43_v11  ;;  %v29_v28 = vld [vmem:[%s741_s1 + $0x28] sm:$0xff]  ;;  %v31_v32 = vld [vmem:[%s741_s1 + $0x38] sm:$0xff]  ;;  %v297_v11 = vsub.s32 0, %v296_v7 }
  0x14   :  { %423 = vmatprep.subr.msk.mxu0 %vm96_vm0, %v42_v14  ;;  %462 = vmatprep.subr.msk.mxu1 %vm96_vm0, %v42_v14  ;;  %v274_v9 = vld [vmem:[#allocation2] sm:$0x1]  ;;  %p522_p3 = por %p521_p2, %p520_p1 }
  0x15   :  { %93 = vperm.xlu1 %494, %v55_v15   ;;  %88 = vperm.xlu0 %493, %v54_v16  }
  0x16   :  { %p523_p4 = pnand %p522_p3, %p516_p0 }
  0x17   :  { %424 = vmatpush3.xpose.msk.msra.mxu0 %vm96_vm0, %v42_v14  ;;  %478 = vmatpush3.xpose.msk.msra.mxu1 %vm96_vm0, %v42_v14 }
  0x18   :  { %425 = vmatprep.subr.msk.mxu0 %vm96_vm0, %v41_v17  ;;  %463 = vmatprep.subr.msk.mxu1 %vm96_vm0, %v41_v17 }
  0x1b   :  { %426 = vmatpush3.xpose.msk.msra.mxu0 %vm96_vm0, %v41_v17  ;;  %479 = vmatpush3.xpose.msk.msra.mxu1 %vm96_vm0, %v41_v17 }
  0x1c   :  { %427 = vmatprep.subr.msk.mxu0 %vm96_vm0, %v40_v18  ;;  %464 = vmatprep.subr.msk.mxu1 %vm96_vm0, %v40_v18 }
  0x1f   :  { %428 = vmatpush3.xpose.msk.msra.mxu0 %vm96_vm0, %v40_v18  ;;  %480 = vmatpush3.xpose.msk.msra.mxu1 %vm96_vm0, %v40_v18 }
  0x20   :  { %429 = vmatprep.subr.msk.mxu0 %vm96_vm0, %v39_v19  ;;  %465 = vmatprep.subr.msk.mxu1 %vm96_vm0, %v39_v19 }
  0x23   :  { %430 = vmatpush3.xpose.msk.msra.mxu0 %vm96_vm0, %v39_v19  ;;  %481 = vmatpush3.xpose.msk.msra.mxu1 %vm96_vm0, %v39_v19 }
  0x24   :  { %431 = vmatprep.subr.msk.mxu0 %vm96_vm0, %v38_v20  ;;  %466 = vmatprep.subr.msk.mxu1 %vm96_vm0, %v38_v20 }
  0x27   :  { %432 = vmatpush3.xpose.msk.msra.mxu0 %vm96_vm0, %v38_v20  ;;  %482 = vmatpush3.xpose.msk.msra.mxu1 %vm96_vm0, %v38_v20 }
  0x28   :  { %433 = vmatprep.subr.msk.mxu0 %vm96_vm0, %v37_v21  ;;  %467 = vmatprep.subr.msk.mxu1 %vm96_vm0, %v37_v21 }
  0x2b   :  { %434 = vmatpush3.xpose.msk.msra.mxu0 %vm96_vm0, %v37_v21  ;;  %483 = vmatpush3.xpose.msk.msra.mxu1 %vm96_vm0, %v37_v21 }
  0x2c   :  { %435 = vmatprep.subr.msk.mxu0 %vm96_vm0, %v36_v22  ;;  %468 = vmatprep.subr.msk.mxu1 %vm96_vm0, %v36_v22 }
  0x2f   :  { %436 = vmatpush3.xpose.msk.msra.mxu0 %vm96_vm0, %v36_v22  ;;  %484 = vmatpush3.xpose.msk.msra.mxu1 %vm96_vm0, %v36_v22 }
  0x30   :  { %437 = vmatprep.subr.msk.mxu0 %vm96_vm0, %v35_v23  ;;  %469 = vmatprep.subr.msk.mxu1 %vm96_vm0, %v35_v23 }
  0x33   :  { %438 = vmatpush3.xpose.msk.msra.mxu0 %vm96_vm0, %v35_v23  ;;  %485 = vmatpush3.xpose.msk.msra.mxu1 %vm96_vm0, %v35_v23 }
  0x34   :  { %439 = vmatprep.subr.msk.mxu0 %vm96_vm0, %v34_v24  ;;  %470 = vmatprep.subr.msk.mxu1 %vm96_vm0, %v34_v24 }
  0x37   :  { %440 = vmatpush3.xpose.msk.msra.mxu0 %vm96_vm0, %v34_v24  ;;  %486 = vmatpush3.xpose.msk.msra.mxu1 %vm96_vm0, %v34_v24 }
  0x38   :  { %441 = vmatprep.subr.msk.mxu0 %vm96_vm0, %v33_v25  ;;  %471 = vmatprep.subr.msk.mxu1 %vm96_vm0, %v33_v25 }
  0x3b   :  { %442 = vmatpush3.xpose.msk.msra.mxu0 %vm96_vm0, %v33_v25  ;;  %487 = vmatpush3.xpose.msk.msra.mxu1 %vm96_vm0, %v33_v25 }
  0x3c   :  { %443 = vmatprep.subr.msk.mxu0 %vm96_vm0, %v32_v26  ;;  %472 = vmatprep.subr.msk.mxu1 %vm96_vm0, %v32_v26 }
  0x3f   :  { %444 = vmatpush3.xpose.msk.msra.mxu0 %vm96_vm0, %v32_v26  ;;  %488 = vmatpush3.xpose.msk.msra.mxu1 %vm96_vm0, %v32_v26 }
  0x42   :  { %446 = vmatmul.mubr.msk.f32.vlgmr.msra.gmra.mxu0 %vm96_vm0, %v25_v27  ;;  %452 = vmatmul.mubr.msk.f32.vlgmr.msra.gmra.mxu1 %vm96_vm0, %v29_v28 }
  0x43   :  { %448 = vmatprep.mubr.msk.f32.mxu0 %vm96_vm0, %v26_v29  ;;  %454 = vmatprep.mubr.msk.f32.mxu1 %vm96_vm0, %v30_v30 }
  0x46   :  { %449 = vmatmul.mubr.msk.f32.gmra.mxu0 %vm96_vm0, %v27_v31  ;;  %455 = vmatmul.mubr.msk.f32.gmra.mxu1 %vm96_vm0, %v31_v32 }
  0x81   :  { %v69_v35 = vpop.permute.xlu1 %68  ;;  %v59_v36 = vpop.permute.xlu0 %58 }
  0x88   :  { %v74_v37 = vpop.permute.xlu1 %73  ;;  %v64_v38 = vpop.permute.xlu0 %63 }
  0x8c   :  { %v84_v39 = vpop.permute.xlu1 %83  ;;  %v79_v40 = vpop.permute.xlu0 %78 }
  0x90   :  { %v94_v45 = vpop.permute.xlu1 %93  ;;  %v89_v50 = vpop.permute.xlu0 %88 }
 0x102   :  { %v447_v41 = vpop.f32.mrf.mxu0  ;;  %v453_v42 = vpop.f32.mrf.mxu1 }
 0x103   :  { %v241_v51 = vadd.f32 %v447_v41, %v64_v38  ;;  %v261_v52 = vadd.f32 %v453_v42, %v84_v39 }
 0x104   :  { %v235_v43 = vpop.f32.mrf.mxu0  ;;  %v255_v44 = vpop.f32.mrf.mxu1 }
 0x105   :  { %v236_v46 = vadd.f32 %v235_v43, %v59_v36  ;;  %v256_v47 = vadd.f32 %v255_v44, %v79_v40  ;;  %v276_v60 = vmax.f32 %v241_v51, %v261_v52 }
 0x106   :  { %v450_v48 = vpop.f32.mrf.mxu0  ;;  %v456_v49 = vpop.f32.mrf.mxu1 }
 0x107   :  { %v251_v53 = vadd.f32 %v450_v48, %v74_v37  ;;  %v271_v54 = vadd.f32 %v456_v49, %v94_v45  ;;  %v275_v57 = vmax.f32 %v236_v46, %v256_v47 }
 0x108   :  { %v245_v55 = vpop.f32.mrf.mxu0  ;;  %v265_v56 = vpop.f32.mrf.mxu1 }
 0x109   :  { %v246_v58 = vadd.f32 %v245_v55, %v69_v35  ;;  %v266_v59 = vadd.f32 %v265_v56, %v89_v50  ;;  %v278_v61 = vmax.f32 %v251_v53, %v271_v54  ;;  %v279_v63 = vmax.f32 %v275_v57, %v276_v60 }
 0x10b   :  { %v277_v62 = vmax.f32 %v246_v58, %v266_v59 }
 0x10d   :  { %v280_v0 = vmax.f32 %v277_v62, %v278_v61  ;;  %v348_v61 = vld [vmem:[%s743_s3] sm:$0x1] }
 0x10f   :  { %v281_v1 = vmax.f32 %v279_v63, %v280_v0 }
 0x111   :  { %v282_v2 = vrot.slane %v281_v1, 4 }
 0x113   :  { %v283_v3 = vmax.f32 %v281_v1, %v282_v2 }
 0x115   :  { %v284_v5 = vrot.slane %v283_v3, 2 }
 0x117   :  { %v285_v6 = vmax.f32 %v283_v3, %v284_v5 }
 0x119   :  { %v286_v8 = vrot.slane %v285_v6, 1 }
 0x11b   :  { %v287_v10 = vmax.f32 %v285_v6, %v286_v8 }
 0x11d   :  { %v288_v12 = vmax.f32 %v274_v9, %v287_v10 }
 0x11f   :  { %v298_v13 = vrot.slane %v288_v12, %v297_v11  ;;  %339 = vst [vmem:[#allocation2] sm:$0x1] %v288_v12  ;;  %v290_v32 = vsub.f32 %v274_v9, %v288_v12 }
 0x121   :  { %v300_v14 = vsub.f32 %v236_v46, %v298_v13  ;;  %v301_v15 = vsub.f32 %v241_v51, %v298_v13  ;;  %v302_v16 = vsub.f32 %v246_v58, %v298_v13  ;;  %v303_v17 = vsub.f32 %v251_v53, %v298_v13 }
 0x122   :  { %v304_v20 = vsub.f32 %v256_v47, %v298_v13  ;;  %v305_v22 = vsub.f32 %v261_v52, %v298_v13  ;;  %v306_v24 = vsub.f32 %v266_v59, %v298_v13  ;;  %v307_v26 = vsub.f32 %v271_v54, %v298_v13  ;;  %v289_v52 = vld [vmem:[#allocation3] sm:$0x1] }
 0x123   :  { %v308_v18 = vmul.f32 1.442695, %v300_v14  ;;  %v310_v19 = vmul.f32 1.442695, %v301_v15  ;;  %v312_v21 = vmul.f32 1.442695, %v302_v16 }
 0x124   :  { %v314_v23 = vmul.f32 1.442695, %v303_v17  ;;  %v316_v25 = vmul.f32 1.442695, %v304_v20  ;;  %v318_v27 = vmul.f32 1.442695, %v305_v22 }
 0x125   :  { %495 = vpow2.f32 %v308_v18  ;;  %v320_v28 = vmul.f32 1.442695, %v306_v24  ;;  %v322_v29 = vmul.f32 1.442695, %v307_v26  ;;  %v291_v37 = vmul.f32 1.442695, %v290_v32 }
 0x126   :  { %497 = vpow2.f32 %v310_v19  ;;  %v343_v60 = vld [vmem:[#allocation2] sm:$0x1] }
 0x127   :  { %499 = vpow2.f32 %v312_v21 }
 0x128   :  { %501 = vpow2.f32 %v314_v23 }
 0x129   :  { %503 = vpow2.f32 %v316_v25 }
 0x12a   :  { %505 = vpow2.f32 %v318_v27 }
 0x12b   :  { %507 = vpow2.f32 %v320_v28 }
 0x12c   :  { %509 = vpow2.f32 %v322_v29 }
 0x12d   :  { %511 = vpow2.f32 %v291_v37 }
 0x132   :  { %v496_v30 = vpop.eup %495 }
 0x133   :  { %v498_v31 = vpop.eup %497 }
 0x134   :  { %v324_v33 = vadd.f32 %v498_v31, %v496_v30  ;;  %v500_v34 = vpop.eup %499 }
 0x135   :  { %v502_v36 = vpop.eup %501 }
 0x136   :  { %v325_v35 = vadd.f32 %v500_v34, %v324_v33  ;;  %v504_v39 = vpop.eup %503 }
 0x137   :  { %v506_v41 = vpop.eup %505 }
 0x138   :  { %v326_v38 = vadd.f32 %v502_v36, %v325_v35  ;;  %v508_v43 = vpop.eup %507 }
 0x139   :  { %v510_v45 = vpop.eup %509 }
 0x13a   :  { %v327_v40 = vadd.f32 %v504_v39, %v326_v38  ;;  %v512_v51 = vpop.eup %511 }
 0x13b   :  { %v293_v54 = vmul.f32 %v512_v51, %v289_v52 }
 0x13c   :  { %v328_v42 = vadd.f32 %v506_v41, %v327_v40 }
 0x13e   :  { %v329_v44 = vadd.f32 %v508_v43, %v328_v42 }
 0x140   :  { %v330_v46 = vadd.f32 %v510_v45, %v329_v44 }
 0x142   :  { %v331_v47 = vrot.slane %v330_v46, 4 }
 0x144   :  { %v332_v48 = vadd.f32 %v331_v47, %v330_v46 }
 0x146   :  { %v333_v49 = vrot.slane %v332_v48, 2 }
 0x148   :  { %v334_v50 = vadd.f32 %v333_v49, %v332_v48 }
 0x14a   :  { %v335_v53 = vrot.slane %v334_v50, 1 }
 0x14c   :  { %v336_v55 = vadd.f32 %v335_v53, %v334_v50 }
 0x14e   :  { %v337_v56 = vadd.f32 %v336_v55, %v293_v54 }
 0x150   :  { %338 = vst [vmem:[#allocation3] sm:$0x1] %v337_v56 }
 0x157   :  { %v344_v57 = vld [vmem:[#allocation3] sm:$0x1] }
 0x158   :  { %513 = vlog2.f32 %v344_v57 }
 0x165   :  { %v514_v58 = vpop.eup %513 }
 0x166   :  { %v346_v59 = vmul.f32 0.6931472, %v514_v58 }
 0x168   :  { %v347_v62 = vadd.f32 %v346_v59, %v343_v60 }
 0x16a   :  { %v349_v63 = vadd.f32 %v348_v61, %v347_v62 }
 0x16c   :  { %350 = vst [vmem:[#allocation4] sm:$0x1] %v349_v63 }
 0x16d   :  { %526 = shalt.err (!%p523_p4)
}
 0x16e   :  { %360 = dma.vmem_to_hbm [thread:$0]  %s358_s26, 16, %s744_s4, [#allocation5]  }
 0x16f   :  { %535 = dma.done.wait [#allocation5], 16  }
 0x170   :  { %536 = vsyncadd [#allocation5], 4294967280 }
 0x171   :  { %364 = vsyncpa [#allocation5], 1 }

</bundles_post_ra>
